<compile_context>
chip_gen: v5e
topology: v5e:2x2
jax: 0.10.0
libtpu: 0.0.40
codegen_flags: <defaults>
</compile_context>

<pallas_src>
import jax
import jax.numpy as jnp
from jax.experimental import pallas as pl
from jax.experimental.pallas import tpu as pltpu


def _round_up(x, m):
    return ((x + m - 1) // m) * m


def _vmem_budget_bytes():
    """~75% of per-core VMEM (48 MiB on v7x, 96 MiB on v5e/v6e); safe fallback."""
    cap = 64 * 1024 * 1024  # conservative: v7x physical VMEM per TensorCore
    try:
        info = pltpu.get_tpu_info()
        cap = int(getattr(info, "vmem_capacity_bytes", cap)) or cap
    except Exception:
        pass
    return (cap * 3) // 4


def _choose_tiles(M_pad, H, budget):
    """Pick (tm, tn) for the full-K matmul so double-buffered tiles fit VMEM."""
    headroom = 4 * 1024 * 1024            # Mosaic internal scratch headroom
    avail = max(budget - headroom, 2 * 1024 * 1024)

    def footprint(tm, tn):
        return (2 * tm * H * 4            # f32 x row tile (double-buffered)
                + 2 * H * tn * 2          # bf16 weight tile (double-buffered)
                + 2 * tn * 4              # bias tile
                + 2 * tm * tn * 4         # f32 output tile (double-buffered)
                + tm * H * 2)             # bf16 x scratch (single buffer)

    tm_cands = [c for c in (1024, 512, 256, 128, 64, 32, 16, 8) if c <= M_pad]
    if not tm_cands:
        tm_cands = [M_pad]

    # Preferred: full bf16 weight resident -> DMA'd from HBM exactly once.
    for tm in tm_cands:
        if footprint(tm, H) <= avail:
            return tm, H

    # Otherwise tile the weight along N with lane-dense (multiple-of-128) tiles
    # that divide H, largest first (<= 1024 preferred).
    divisors = [d for d in range(128, H, 128) if H % d == 0]
    tn_cands = (sorted([d for d in divisors if d <= 1024], reverse=True)
                or sorted(divisors, reverse=True))
    for tn in tn_cands:
        for tm in tm_cands:
            if footprint(tm, tn) <= avail:
                return tm, tn

    # TODO(synk): for very large / ragged H add a K-tiled accumulator path
    # (grid=(M/tm, N/tn, K/tk), f32 scratch accumulator, pl.when init/finalize)
    # so the VMEM footprint becomes independent of H.
    return tm_cands[-1], (tn_cands[-1] if tn_cands else H)


def _make_residual_kernel(tn, n_tiles):
    lane_aligned = (tn % 128 == 0)

    def kernel(x_ref, w_ref, b_ref, o_ref, xbf_ref):
        # x_ref:   (tm, H)  f32   -- full-K row tile (constant across j)
        # w_ref:   (H, tn)  bf16  -- weight tile (constant block when resident)
        # b_ref:   (1, tn)  f32
        # o_ref:   (tm, tn) f32
        # xbf_ref: (tm, H)  bf16  -- x cast once per row block
        j = pl.program_id(1)

        @pl.when(j == 0)
        def _():
            xbf_ref[...] = x_ref[...].astype(jnp.bfloat16)

        y = jnp.dot(xbf_ref[...], w_ref[...],
                    preferred_element_type=jnp.float32)

        # Residual comes from the already-resident f32 x tile (no extra HBM read).
        if n_tiles == 1:
            res = x_ref[...]
        else:
            col = j * tn
            if lane_aligned:
                col = pl.multiple_of(col, 128)
            res = x_ref[:, pl.ds(col, tn)]

        o_ref[...] = (y + b_ref[...] + res).astype(o_ref.dtype)

    return kernel


def residual_linear(x, w, b):
    """fn(x) + x with fn = Linear(H, H): (x @ w + b) + x, fused in one Pallas kernel.

    x: (B, S, H) float32
    w: (H, H)    float32 (cast once to bf16 for the MXU; f32 accumulation)
    b: (H,)      float32
    """
    B, S, H = x.shape
    M = B * S
    x2 = x.reshape(M, H)

    # Pad rows only to the sublane multiple (at most 7 rows); ragged row tiles
    # are handled by the grid's cdiv + masked boundary stores.
    M_pad = _round_up(M, 8)
    if M_pad != M:
        x2 = jnp.pad(x2, ((0, M_pad - M), (0, 0)))

    budget = _vmem_budget_bytes()
    tm, tn = _choose_tiles(M_pad, H, budget)
    grid_m = pl.cdiv(M_pad, tm)
    grid_n = pl.cdiv(H, tn)

    w_bf16 = w.astype(jnp.bfloat16)
    b2 = b.reshape(1, H).astype(jnp.float32)

    # Weight HBM traffic: once when fully resident (constant block index),
    # otherwise re-streamed once per row block.
    weight_passes = 1 if grid_n == 1 else grid_m
    cost = pl.CostEstimate(
        flops=2 * M_pad * H * H,
        transcendentals=0,
        bytes_accessed=(
            M_pad * H * 4                    # x read once (residual reuses the tile)
            + M_pad * H * 4                  # output
            + weight_passes * H * H * 2      # bf16 weight
            + weight_passes * H * 4          # bias
        ),
    )

    kernel = _make_residual_kernel(tn, grid_n)

    out2 = pl.pallas_call(
        kernel,
        out_shape=jax.ShapeDtypeStruct((M_pad, H), x.dtype),
        grid_spec=pltpu.PrefetchScalarGridSpec(
            num_scalar_prefetch=0,
            grid=(grid_m, grid_n),
            in_specs=[
                pl.BlockSpec((tm, H), lambda i, j: (i, 0)),   # x rows, full K
                pl.BlockSpec((H, tn), lambda i, j: (0, j)),   # weight N-tile
                pl.BlockSpec((1, tn), lambda i, j: (0, j)),   # bias N-tile
            ],
            out_specs=pl.BlockSpec((tm, tn), lambda i, j: (i, j)),
            scratch_shapes=[pltpu.VMEM((tm, H), jnp.bfloat16)],
        ),
        compiler_params=pltpu.CompilerParams(
            # j is "arbitrary": the bf16-cast scratch is refreshed at j == 0,
            # so the N axis must not be split across cores; M carries the
            # megacore parallelism.
            dimension_semantics=("parallel", "arbitrary"),
            vmem_limit_bytes=int(budget),
        ),
        cost_estimate=cost,
    )(x2, w_bf16, b2)

    if M_pad != M:
        out2 = out2[:M]
    return out2.reshape(B, S, H)


if __name__ == "__main__":
    key = jax.random.PRNGKey(0)
    kx, kw, kb = jax.random.split(key, 3)

    # Lane-dense hidden dim (multiple of 128); small batch/seq.
    B, S, H = 2, 8, 128
    x = jax.random.normal(kx, (B, S, H), dtype=jnp.float32)
    # Deterministic synthetic parameters for fn = Linear(H, H).
    # TODO(synk): Residual wraps an arbitrary fn; only fn = Linear is fused here.
    w = jax.random.normal(kw, (H, H), dtype=jnp.float32) * 0.02
    b = jax.random.normal(kb, (H,), dtype=jnp.float32) * 0.02

    out = residual_linear(x, w, b)
    out = jax.block_until_ready(out)

    # Reference: fn(x) + x with the same bf16-matmul / f32-accumulate recipe.
    x2 = x.reshape(B * S, H)
    ref2 = (
        jnp.dot(
            x2.astype(jnp.bfloat16),
            w.astype(jnp.bfloat16),
            preferred_element_type=jnp.float32,
        )
        + b
        + x2
    )
    ref = ref2.reshape(B, S, H)

    assert out.shape == (B, S, H)
    assert jnp.allclose(out, ref, atol=2e-2, rtol=2e-2), "mismatch vs reference"

    print("KERNEL_OK")
</pallas_src>

<mosaic_0001>
module attributes {stable_mosaic.version = 11 : i64} {
  func.func @kernel(%arg0: i32, %arg1: i32, %arg2: memref<16x128xf32, #tpu.memory_space<vmem>>, %arg3: memref<128x128xbf16, #tpu.memory_space<vmem>>, %arg4: memref<1x128xf32, #tpu.memory_space<vmem>>, %arg5: memref<16x128xf32, #tpu.memory_space<vmem>>, %arg6: memref<16x128xbf16, #tpu.memory_space<vmem>>) attributes {dimension_semantics = [#tpu.dimension_semantics<parallel>, #tpu.dimension_semantics<arbitrary>], iteration_bounds = array<i64: 1, 1>, scalar_prefetch = 0 : i64, scratch_operands = 1 : i64, tpu.core_type = #tpu.core_type<tc>, window_params = [{transform_indices = @transform_0, window_bounds = array<i64: 16, 128>}, {transform_indices = @transform_1, window_bounds = array<i64: 128, 128>}, {transform_indices = @transform_2, window_bounds = array<i64: 1, 128>}, {transform_indices = @transform_3, window_bounds = array<i64: 16, 128>}]} {
    %c0_i32 = arith.constant 0 : i32
    %0 = arith.cmpi eq, %arg1, %c0_i32 : i32
    %1 = arith.extui %0 : i1 to i32
    %c0_i32_0 = arith.constant 0 : i32
    %2 = arith.cmpi ne, %1, %c0_i32_0 : i32
    scf.if %2 {
      %c0_10 = arith.constant 0 : index
      %c0_11 = arith.constant 0 : index
      %12 = vector.load %arg2[%c0_10, %c0_11] : memref<16x128xf32, #tpu.memory_space<vmem>>, vector<16x128xf32>
      %13 = arith.truncf %12 : vector<16x128xf32> to vector<16x128xbf16>
      %c0_12 = arith.constant 0 : index
      %c0_13 = arith.constant 0 : index
      %14 = vector.load %arg6[%c0_12, %c0_13] : memref<16x128xbf16, #tpu.memory_space<vmem>>, vector<16x128xbf16>
      tpu.vector_store %arg6[%c0_12, %c0_13], %13 {strides = array<i32>} : memref<16x128xbf16, #tpu.memory_space<vmem>>, vector<16x128xbf16>,
    } else {
    }
    %c0 = arith.constant 0 : index
    %c0_1 = arith.constant 0 : index
    %3 = vector.load %arg6[%c0, %c0_1] : memref<16x128xbf16, #tpu.memory_space<vmem>>, vector<16x128xbf16>
    %c0_2 = arith.constant 0 : index
    %c0_3 = arith.constant 0 : index
    %4 = vector.load %arg3[%c0_2, %c0_3] : memref<128x128xbf16, #tpu.memory_space<vmem>>, vector<128x128xbf16>
    %cst = arith.constant dense<0.000000e+00> : vector<16x128xf32>
    %5 = tpu.matmul %3, %4, %cst {dimension_numbers = #tpu.dot_dimension_numbers<[1], [0], [0], [1], [0, 0, 1, 1], [], []>} : vector<16x128xbf16>, vector<128x128xbf16>, vector<16x128xf32> -> vector<16x128xf32>
    %c0_4 = arith.constant 0 : index
    %c0_5 = arith.constant 0 : index
    %6 = vector.load %arg2[%c0_4, %c0_5] : memref<16x128xf32, #tpu.memory_space<vmem>>, vector<16x128xf32>
    %c0_6 = arith.constant 0 : index
    %c0_7 = arith.constant 0 : index
    %7 = vector.load %arg4[%c0_6, %c0_7] : memref<1x128xf32, #tpu.memory_space<vmem>>, vector<1x128xf32>
    %8 = vector.broadcast %7 : vector<1x128xf32> to vector<16x128xf32>
    %9 = arith.addf %5, %8 : vector<16x128xf32>
    %10 = arith.addf %9, %6 : vector<16x128xf32>
    %c0_8 = arith.constant 0 : index
    %c0_9 = arith.constant 0 : index
    %11 = vector.load %arg5[%c0_8, %c0_9] : memref<16x128xf32, #tpu.memory_space<vmem>>, vector<16x128xf32>
    tpu.vector_store %arg5[%c0_8, %c0_9], %10 {strides = array<i32>} : memref<16x128xf32, #tpu.memory_space<vmem>>, vector<16x128xf32>,
    return
  }
  func.func @transform_0(%arg0: i32, %arg1: i32) -> (i32, i32) {
    %c0_i32 = arith.constant 0 : i32
    %c0_i32_0 = arith.constant 0 : i32
    return %arg0, %c0_i32 : i32, i32
  }
  func.func @transform_1(%arg0: i32, %arg1: i32) -> (i32, i32) {
    %c0_i32 = arith.constant 0 : i32
    %c0_i32_0 = arith.constant 0 : i32
    return %c0_i32, %arg1 : i32, i32
  }
  func.func @transform_2(%arg0: i32, %arg1: i32) -> (i32, i32) {
    %c0_i32 = arith.constant 0 : i32
    %c0_i32_0 = arith.constant 0 : i32
    return %c0_i32, %arg1 : i32, i32
  }
  func.func @transform_3(%arg0: i32, %arg1: i32) -> (i32, i32) {
    %c0_i32 = arith.constant 0 : i32
    return %arg0, %arg1 : i32, i32
  }
}

</mosaic_0001>

<bundles_post_ra>
// kernel: tpu_custom_call.1
= control target key start
LH: loop header
LB: loop body
LE: loop exit
PB: predicated region body
PF: predicated region fallthrough
CT: control target
= control target key end

     0   :  { %8 = vsyncpa [#allocation4], 0  ;;  %s354_s0 = inlined_call_operand.hbm [shape: f32[16,128], index: 0, kind: input, shape index: {}]   ;;  %s355_s1 = inlined_call_operand.hbm [shape: bf16[128,128], index: 1, kind: input, shape index: {}]   ;;  %s356_s2 = inlined_call_operand.vmem [shape: f32[1,128], index: 2, kind: input, shape index: {}]   ;;  %s357_s3 = inlined_call_operand.hbm [shape: f32[16,128], index: 3, kind: output, shape index: {}]  }
   0x1   :  { %9 = vsyncpa [#allocation7], 0 }
   0x2   :  { %10 = vsyncpa [#allocation5], 0  ;;  %s15_s14 = sshll.u32 %s354_s0, 4  ;;  %s309_s15 = smov [#allocation3]   ;;  %s16_s14 = int_to_ptr.hbm [resolvable:$true] %s15_s14 }
   0x3   :  { %s17_s16 = sshll.u32 %s309_s15, 4  ;;  %s28_s19 = sshll.u32 %s355_s1, 4  ;;  %s18_s16 = int_to_ptr.vmem [resolvable:$true] %s17_s16  ;;  %s29_s19 = int_to_ptr.hbm [resolvable:$true] %s28_s19 }
   0x4   :  { %s310_s20 = smov 128   ;;  %s311_s21 = smov 8  }
   0x5   :  { %23 = dma.hbm_to_vmem [thread:$0]  %s16_s14, 256, %s18_s16, [#allocation4], %s310_s20, %s310_s20, %s311_s21  }
   0x6   :  { %s312_s22 = smov [#allocation6]   ;;  %s313_s24 = smov 64  }
   0x7   :  { %s30_s23 = sshll.u32 %s312_s22, 4  ;;  %s314_s0 = smov 4   ;;  %s31_s23 = int_to_ptr.vmem [resolvable:$true] %s30_s23 }
   0x8   :  { %36 = dma.hbm_to_vmem [thread:$0]  %s29_s19, 1024, %s31_s23, [#allocation7], %s313_s24, %s313_s24, %s314_s0  }
   0x9   :  { %303 = dma.done.wait [#allocation4], 256  }
   0xa   :  { %304 = vsyncadd [#allocation4], 4294967040 }
   0xb   :  { %305 = dma.done.wait [#allocation7], 1024  }
   0xc   :  { %306 = vsyncadd [#allocation7], 4294966272  ;;  %v217_v0 = vld [vmem:[#allocation6 + $0x38] sm:$0xff]  ;;  %v216_v1 = vld [vmem:[#allocation6 + $0x30] sm:$0xff]  ;;  %s315_s26 = smov [#allocation8]   ;;  %s159_s30 = sshll.u32 %s357_s3, 4  ;;  %s160_s30 = int_to_ptr.hbm [resolvable:$true] %s159_s30 }
   0xd   :  { %135 = vmatpush.bf16.msra.mxu0 %v217_v0  ;;  %v51_v2 = vld [vmem:[#allocation3] sm:$0xff]  ;;  %v52_v3 = vld [vmem:[#allocation3 + $0x8] sm:$0xff]  ;;  %v215_v5 = vld [vmem:[#allocation6 + $0x28] sm:$0xff]  ;;  %s157_s27 = sshll.u32 %s315_s26, 4  ;;  %s158_s27 = int_to_ptr.vmem [resolvable:$true] %s157_s27 }
   0xe   :  { %v221_v4 = vpack.c.bf16 %v52_v3, %v51_v2  ;;  %v214_v6 = vld [vmem:[#allocation6 + $0x20] sm:$0xff]  ;;  %v213_v7 = vld [vmem:[#allocation6 + $0x18] sm:$0xff]  ;;  %v212_v8 = vld [vmem:[#allocation6 + $0x10] sm:$0xff] }
   0xf   :  { %v211_v9 = vld [vmem:[#allocation6 + $0x8] sm:$0xff]  ;;  %v210_v10 = vld [vmem:[#allocation6] sm:$0xff] }
  0x10   :  { %222 = vst [vmem:[#allocation2] sm:$0xff] %v221_v4   ;;  %v230_v12 = vld [vmem:[%s356_s2] ss:$0 sm:$0xff] }
  0x11   :  { %136 = vmatpush.bf16.msra.mxu0 %v216_v1 }
  0x15   :  { %137 = vmatpush.bf16.msra.mxu0 %v215_v5 }
  0x17   :  { %v209_v11 = vld [vmem:[#allocation2] sm:$0xff] }
  0x19   :  { %138 = vmatpush.bf16.msra.mxu0 %v214_v6 }
  0x1d   :  { %139 = vmatpush.bf16.msra.mxu0 %v213_v7 }
  0x21   :  { %140 = vmatpush.bf16.msra.mxu0 %v212_v8 }
  0x25   :  { %141 = vmatpush.bf16.msra.mxu0 %v211_v9 }
  0x29   :  { %142 = vmatpush.bf16.msra.mxu0 %v210_v10 }
  0x2c   :  { %143 = vmatmul.bf16.vlgmr.msra.gmra.mxu0 %v209_v11 }
  0xa9   :  { %v144_v13 = vpop.f32.mrf.mxu0 }
  0xaa   :  { %v145_v14 = vadd.f32 %v230_v12, %v144_v13 }
  0xac   :  { %v149_v15 = vadd.f32 %v145_v14, %v51_v2 }
  0xae   :  { %151 = vst [vmem:[#allocation8] sm:$0xff] %v149_v15 }
  0xb1   :  { %v146_v16 = vpop.f32.mrf.mxu0 }
  0xb2   :  { %v147_v17 = vadd.f32 %v230_v12, %v146_v16 }
  0xb4   :  { %v150_v18 = vadd.f32 %v147_v17, %v52_v3 }
  0xb6   :  { %152 = vst [vmem:[#allocation8 + $0x8] sm:$0xff] %v150_v18 }
  0xb7   :  { %165 = dma.vmem_to_hbm [thread:$0]  %s158_s27, 256, %s160_s30, [#allocation5], %s310_s20, %s310_s20, %s311_s21  }
  0xb8   :  { %307 = dma.done.wait [#allocation5], 256  }
  0xb9   :  { %308 = vsyncadd [#allocation5], 4294967040 }
  0xba   :  { %170 = vsyncpa [#allocation4], 1 }
  0xbb   :  { %171 = vsyncpa [#allocation7], 1 }
  0xbc   :  { %172 = vsyncpa [#allocation5], 1 }

</bundles_post_ra>
